<compile_context>
chip_gen: v7x
topology: tpu7x:2x2x1
jax: 0.10.0
libtpu: 0.0.40
codegen_flags: <defaults>
</compile_context>

<pallas_src>
import functools
import math

import jax
import jax.numpy as jnp
from jax import lax
from jax.experimental import pallas as pl
from jax.experimental.pallas import tpu as pltpu


def _round_up(a: int, b: int) -> int:
    return -(-a // b) * b


def _sublane_base(itemsize: int) -> int:
    # f32 -> 8, bf16/f16 -> 16, int8/fp8 -> 32 sublanes per vreg tile.
    return {4: 8, 2: 16, 1: 32}.get(itemsize, 8)


def _pick_tile(dim: int, target: int, base: int):
    """Tile that is a multiple of `base`, roughly <= target, with minimal padding.

    Returns (tile, padded_dim) with padded_dim % tile == 0.
    """
    target = max(target, base)
    padded_min = _round_up(dim, base)
    if padded_min <= target:
        return padded_min, padded_min          # single block covers the dim
    nblocks = -(-dim // target)
    tile = _round_up(-(-dim // nblocks), base)
    return tile, tile * nblocks


def _fc_leaky_kernel(x_ref, w_ref, b_ref, o_ref, *scratch, num_k: int,
                     use_relu: bool, negative_slope: float):
    # x tile: (tm, tk); w tile: (tk, tn)  ->  canonical (M,K)x(K,N) MXU matmul.
    dot = lax.dot_general(
        x_ref[...], w_ref[...],
        dimension_numbers=(((1,), (0,)), ((), ())),
        preferred_element_type=jnp.float32)

    def _epilogue(acc):
        acc = acc + b_ref[...]                       # (1, tn) broadcast over M
        if use_relu:
            acc = jnp.where(acc >= 0, acc, negative_slope * acc)
        o_ref[...] = acc.astype(o_ref.dtype)

    if num_k == 1:
        # Whole reduction in one grid step: no accumulator round-trip at all.
        _epilogue(dot)
    else:
        acc_ref, = scratch
        k = pl.program_id(2)

        @pl.when(k == 0)
        def _():
            acc_ref[...] = dot                       # fused init + first accum

        @pl.when(k > 0)
        def _():
            acc_ref[...] += dot

        @pl.when(k == num_k - 1)
        def _():
            _epilogue(acc_ref[...])


def prepare_fc_params(weight, bias, *, tile_n: int = 512, tile_k: int = 1024,
                      compute_dtype=None):
    """One-time parameter prep (call at init, NOT per forward).

    Transposes the PyTorch (N, K) weight to (K, N), zero-pads it to tile
    multiples, optionally casts it to a narrower compute dtype (e.g. bf16),
    and prepares an f32 (1, Np) bias row.
    """
    N, K = weight.shape
    assert bias.shape == (N,)
    if compute_dtype is not None:
        weight = weight.astype(compute_dtype)

    # K: lane dim of x / sublane dim of the (K,N) weight -> 128 granularity.
    tk, Kp = _pick_tile(K, tile_k, 128)
    # N: lane dim of the weight and output -> 128 granularity keeps output
    # stores lane-dense; for common N the tile is naturally a 256 multiple
    # (v6e/v7x MXU width).
    tn, Np = _pick_tile(N, tile_n, 128)

    w_kn = weight.T                                   # one-time (N,K) -> (K,N)
    if (Kp, Np) != (K, N):
        w_kn = jnp.pad(w_kn, ((0, Kp - K), (0, Np - N)))
    b = bias.astype(jnp.float32).reshape(1, N)
    if Np != N:
        b = jnp.pad(b, ((0, 0), (0, Np - N)))

    return dict(w_kn=w_kn, bias=b, N=N, K=K, Np=Np, Kp=Kp,
                tile_n=tn, tile_k=tk, compute_dtype=compute_dtype)


def fc_with_leaky(x, params, *, use_relu: bool = False,
                  negative_slope: float = 0.01, tile_m: int = 512):
    """x: (..., K); params from prepare_fc_params. Returns (..., N)."""
    orig_shape = x.shape
    N, K, Np, Kp = params["N"], params["K"], params["Np"], params["Kp"]
    assert orig_shape[-1] == K
    out_dtype = x.dtype

    x2 = x.reshape(-1, K)
    if params["compute_dtype"] is not None:
        x2 = x2.astype(params["compute_dtype"])
    M = x2.shape[0]

    sub = _sublane_base(jnp.dtype(x2.dtype).itemsize)
    tm, Mp = _pick_tile(M, tile_m, sub)
    tn, tk = params["tile_n"], params["tile_k"]

    grid_m, grid_n = Mp // tm, Np // tn
    # v7x megacore: ensure >= 2 blocks along a parallel axis so both
    # TensorCores get work.  No-op on single-TC v5e/v6e and on tiny shapes.
    if grid_m * grid_n == 1:
        if tm % (2 * sub) == 0:
            tm //= 2
            grid_m = 2
        elif tn % 256 == 0:
            tn //= 2
            grid_n = 2
    num_k = Kp // tk
    grid = (grid_m, grid_n, num_k)

    # Pad x only where needed (weight/bias were padded once at prep time).
    if (Mp, Kp) != (M, K):
        x2 = jnp.pad(x2, ((0, Mp - M), (0, Kp - K)))

    kernel = functools.partial(_fc_leaky_kernel, num_k=num_k,
                               use_relu=use_relu, negative_slope=negative_slope)

    in_bytes = jnp.dtype(x2.dtype).itemsize
    w_bytes = jnp.dtype(params["w_kn"].dtype).itemsize
    out_bytes = jnp.dtype(out_dtype).itemsize

    # Explicit scoped-VMEM budget: double-buffered operand/output tiles plus
    # the f32 accumulator, with headroom for Mosaic internal scratch.
    footprint = (2 * (tm * tk * in_bytes + tk * tn * w_bytes + tn * 4
                      + tm * tn * out_bytes)
                 + (tm * tn * 4 if num_k > 1 else 0))
    vmem_limit = int(min(48 << 20, max(footprint + (8 << 20), 32 << 20)))

    cost = pl.CostEstimate(
        flops=2 * M * N * K, transcendentals=0,
        bytes_accessed=(M * K * in_bytes + K * N * w_bytes
                        + M * N * out_bytes + N * 4))

    scratch = [] if num_k == 1 else [pltpu.VMEM((tm, tn), jnp.float32)]

    out_p = pl.pallas_call(
        kernel,
        out_shape=jax.ShapeDtypeStruct((Mp, Np), out_dtype),
        grid_spec=pltpu.PrefetchScalarGridSpec(
            num_scalar_prefetch=0,
            grid=grid,
            in_specs=[
                pl.BlockSpec((tm, tk), lambda i, j, k: (i, k)),   # x   (M, K)
                pl.BlockSpec((tk, tn), lambda i, j, k: (k, j)),   # W   (K, N)
                pl.BlockSpec((1, tn), lambda i, j, k: (0, j)),    # b   (1, N)
            ],
            out_specs=pl.BlockSpec((tm, tn), lambda i, j, k: (i, j)),
            scratch_shapes=scratch,
        ),
        compiler_params=pltpu.CompilerParams(
            dimension_semantics=("parallel", "parallel", "arbitrary"),
            vmem_limit_bytes=vmem_limit),
        cost_estimate=cost,
    )(x2, params["w_kn"], params["bias"])

    out = out_p[:M, :N]
    return out.reshape(orig_shape[:-1] + (N,))


def fc_with_leaky_raw(x, weight, bias, **kw):
    """Convenience: prep + apply in one call (prefer prepare_fc_params once)."""
    prep_kw = {k: kw.pop(k) for k in ("tile_n", "tile_k", "compute_dtype")
               if k in kw}
    return fc_with_leaky(x, prepare_fc_params(weight, bias, **prep_kw), **kw)


def _reference(x, weight, bias, use_relu, negative_slope=0.01):
    out = x @ weight.T + bias
    if use_relu:
        out = jnp.where(out >= 0, out, negative_slope * out)
    return out


if __name__ == "__main__":
    key = jax.random.PRNGKey(0)
    k_x, k_w, k_b = jax.random.split(key, 3)

    # Small shapes implied by the module (a plain FC layer).
    batch, in_f, out_f = 8, 32, 32
    x = jax.random.normal(k_x, (batch, in_f), dtype=jnp.float32)
    bound = 1.0 / math.sqrt(in_f)
    weight = jax.random.uniform(k_w, (out_f, in_f), minval=-bound, maxval=bound,
                                dtype=jnp.float32)
    bias = jax.random.uniform(k_b, (out_f,), minval=-bound, maxval=bound,
                              dtype=jnp.float32)

    params = prepare_fc_params(weight, bias)   # one-time transpose + pad
    for use_relu in (False, True):
        out = jax.block_until_ready(fc_with_leaky(x, params, use_relu=use_relu))
        ref = _reference(x, weight, bias, use_relu)
        assert out.shape == (batch, out_f)
        assert jnp.allclose(out, ref, atol=1e-5, rtol=1e-5), "mismatch (small)"

    # Multi-K-tile accumulation path with an unaligned M edge and odd N.
    k_x2, k_w2, k_b2 = jax.random.split(jax.random.PRNGKey(1), 3)
    M2, K2, N2 = 200, 1536, 384
    x2 = jax.random.normal(k_x2, (M2, K2), dtype=jnp.float32)
    w2 = jax.random.normal(k_w2, (N2, K2), dtype=jnp.float32) * 0.05
    b2 = jax.random.normal(k_b2, (N2,), dtype=jnp.float32)
    p2 = prepare_fc_params(w2, b2, tile_k=1024)
    out2 = jax.block_until_ready(fc_with_leaky(x2, p2, use_relu=True))
    ref2 = _reference(x2, w2, b2, True)
    assert out2.shape == (M2, N2)
    assert jnp.allclose(out2, ref2, atol=1e-3, rtol=1e-3), "mismatch (tiled)"

    # Optional bf16 compute path (f32 bias / accumulator / output).
    p3 = prepare_fc_params(w2, b2, compute_dtype=jnp.bfloat16)
    out3 = jax.block_until_ready(fc_with_leaky(x2, p3, use_relu=True))
    assert out3.dtype == jnp.float32
    assert jnp.allclose(out3, ref2, atol=0.15, rtol=0.05), "mismatch (bf16)"

    print("KERNEL_OK")
</pallas_src>

<mosaic_0001>
module attributes {stable_mosaic.version = 11 : i64} {
  func.func @_fc_leaky_kernel(%arg0: i32, %arg1: i32, %arg2: i32, %arg3: memref<8x128xf32, #tpu.memory_space<vmem>>, %arg4: memref<128x128xf32, #tpu.memory_space<vmem>>, %arg5: memref<1x128xf32, #tpu.memory_space<vmem>>, %arg6: memref<8x128xf32, #tpu.memory_space<vmem>>) attributes {dimension_semantics = [#tpu.dimension_semantics<parallel>, #tpu.dimension_semantics<parallel>, #tpu.dimension_semantics<arbitrary>], iteration_bounds = array<i64: 1, 1, 1>, scalar_prefetch = 0 : i64, scratch_operands = 0 : i64, tpu.core_type = #tpu.core_type<tc>, window_params = [{transform_indices = @transform_0, window_bounds = array<i64: 8, 128>}, {transform_indices = @transform_1, window_bounds = array<i64: 128, 128>}, {transform_indices = @transform_2, window_bounds = array<i64: 1, 128>}, {transform_indices = @transform_3, window_bounds = array<i64: 8, 128>}]} {
    %c0 = arith.constant 0 : index
    %c0_0 = arith.constant 0 : index
    %0 = vector.load %arg3[%c0, %c0_0] : memref<8x128xf32, #tpu.memory_space<vmem>>, vector<8x128xf32>
    %c0_1 = arith.constant 0 : index
    %c0_2 = arith.constant 0 : index
    %1 = vector.load %arg4[%c0_1, %c0_2] : memref<128x128xf32, #tpu.memory_space<vmem>>, vector<128x128xf32>
    %cst = arith.constant dense<0.000000e+00> : vector<8x128xf32>
    %2 = tpu.matmul %0, %1, %cst {dimension_numbers = #tpu.dot_dimension_numbers<[1], [0], [0], [1], [0, 0, 1, 1], [], []>} : vector<8x128xf32>, vector<128x128xf32>, vector<8x128xf32> -> vector<8x128xf32>
    %c0_3 = arith.constant 0 : index
    %c0_4 = arith.constant 0 : index
    %3 = vector.load %arg5[%c0_3, %c0_4] : memref<1x128xf32, #tpu.memory_space<vmem>>, vector<1x128xf32>
    %4 = vector.broadcast %3 : vector<1x128xf32> to vector<8x128xf32>
    %5 = arith.addf %2, %4 : vector<8x128xf32>
    %c0_5 = arith.constant 0 : index
    %c0_6 = arith.constant 0 : index
    %6 = vector.load %arg6[%c0_5, %c0_6] : memref<8x128xf32, #tpu.memory_space<vmem>>, vector<8x128xf32>
    tpu.vector_store %arg6[%c0_5, %c0_6], %5 {strides = array<i32>} : memref<8x128xf32, #tpu.memory_space<vmem>>, vector<8x128xf32>,
    return
  }
  func.func @transform_0(%arg0: i32, %arg1: i32, %arg2: i32) -> (i32, i32) {
    %c0_i32 = arith.constant 0 : i32
    return %arg0, %arg2 : i32, i32
  }
  func.func @transform_1(%arg0: i32, %arg1: i32, %arg2: i32) -> (i32, i32) {
    %c0_i32 = arith.constant 0 : i32
    return %arg2, %arg1 : i32, i32
  }
  func.func @transform_2(%arg0: i32, %arg1: i32, %arg2: i32) -> (i32, i32) {
    %c0_i32 = arith.constant 0 : i32
    %c0_i32_0 = arith.constant 0 : i32
    return %c0_i32, %arg1 : i32, i32
  }
  func.func @transform_3(%arg0: i32, %arg1: i32, %arg2: i32) -> (i32, i32) {
    %c0_i32 = arith.constant 0 : i32
    return %arg0, %arg1 : i32, i32
  }
}

</mosaic_0001>

<bundles_post_ra>
// kernel: tpu_custom_call.1
= control target key start
LH: loop header
LB: loop body
LE: loop exit
PB: predicated region body
PF: predicated region fallthrough
CT: control target
= control target key end

     0   :  { %8 = vsyncpa [#allocation3], 0  ;;  %s383_s0 = inlined_call_operand.hbm [shape: f32[8,128], index: 0, kind: input, shape index: {}]   ;;  %s384_s1 = inlined_call_operand.hbm [shape: f32[128,128], index: 1, kind: input, shape index: {}]   ;;  %s385_s2 = inlined_call_operand.vmem [shape: f32[1,128], index: 2, kind: input, shape index: {}]   ;;  %s386_s3 = inlined_call_operand.hbm [shape: f32[8,128], index: 3, kind: output, shape index: {}]  }
   0x1   :  { %9 = vsyncpa [#allocation6], 0 }
   0x2   :  { %10 = vsyncpa [#allocation4], 0  ;;  %s309_s12 = smov [#allocation2]   ;;  %s310_s14 = smov [#allocation5]  }
   0x3   :  { %s17_s13 = sshll.u32 %s309_s12, 4  ;;  %s26_s15 = sshll.u32 %s310_s14, 4  ;;  %s18_s13 = int_to_ptr.vmem [resolvable:$true] %s17_s13  ;;  %s337_s15 = int_to_ptr.vmem [resolvable:$true] %s26_s15 }
   0x4   :  { %s237_s18 = scalar_lea.hbm %s383_s0, 128 }
   0x5   :  { %p238_p0 = scmp.ne.s32.totalorder %s383_s0, %s237_s18  ;;  %p241_p1 = scmp.lt.u32.totalorder %s237_s18, %s383_s0 }
   0x7   :  { %p243_p2 = pnand %p241_p1, %p238_p0 }
   0x9   :  { %246 = shalt.err (!%p243_p2)
}
   0xa   :  { %s247_s23 = scalar_lea.vmem %s18_s13, 128  ;;  %p252_p4 = scmp.lt.s32.totalorder %s18_s13, %s18_s13 }
   0xb   :  { %p248_p3 = scmp.ne.s32.totalorder %s18_s13, %s247_s23  ;;  %p253_p5 = scmp.lt.s32.totalorder %s247_s23, %s247_s23 }
   0xd   :  { %p254_p6 = por %p253_p5, %p252_p4 }
   0xf   :  { %p255_p7 = pnand %p254_p6, %p248_p3 }
  0x11   :  { %258 = shalt.err (!%p255_p7)
}
  0x12   :  { %20 = dma.hbm_to_vmem [thread:$0]  %s383_s0, 128, %s18_s13, [#allocation3]  }
  0x13   :  { %s259_s28 = scalar_lea.hbm %s384_s1, 2048 }
  0x14   :  { %p260_p8 = scmp.ne.s32.totalorder %s384_s1, %s259_s28  ;;  %p263_p9 = scmp.lt.u32.totalorder %s259_s28, %s384_s1 }
  0x16   :  { %p265_p10 = pnand %p263_p9, %p260_p8 }
  0x18   :  { %268 = shalt.err (!%p265_p10)
}
  0x19   :  { %s269_s6 = scalar_lea.vmem %s337_s15, 2048  ;;  %p274_p12 = scmp.lt.s32.totalorder %s337_s15, %s337_s15 }
  0x1a   :  { %p270_p11 = scmp.ne.s32.totalorder %s337_s15, %s269_s6  ;;  %p275_p13 = scmp.lt.s32.totalorder %s269_s6, %s269_s6 }
  0x1c   :  { %p276_p0 = por %p275_p13, %p274_p12 }
  0x1e   :  { %p277_p1 = pnand %p276_p0, %p270_p11 }
  0x20   :  { %280 = shalt.err (!%p277_p1)
}
  0x21   :  { %s311_s0 = smov 128   ;;  %s312_s7 = smov 8  }
  0x22   :  { %32 = dma.hbm_to_vmem [thread:$0]  %s384_s1, 2048, %s337_s15, [#allocation6], %s311_s0, %s311_s0, %s312_s7  }
  0x23   :  { %303 = dma.done.wait [#allocation3], 128  }
  0x24   :  { %304 = vsyncadd [#allocation3], 4294967168 }
  0x25   :  { %305 = dma.done.wait [#allocation6], 2048  }
  0x26   :  { %306 = vsyncadd [#allocation6], 4294965248  ;;  %v313_v0 = vmov 0.0|0.0   ;;  %vm314_vm0 = vmmov 0   ;;  %v315_v1 = vmov 0.0   ;;  %v42_v2 = vld [vmem:[#allocation5] sm:$0xff] }
  0x27   :  { %205 = vmatprep.subr.bf16.mxu0 %v313_v0  ;;  %202 = vmatprep.mubr.msk.f32.mxu0 %vm314_vm0, %v315_v1  ;;  %v43_v3 = vld [vmem:[#allocation5 + $0x8] sm:$0xff]  ;;  %v44_v4 = vld [vmem:[#allocation5 + $0x10] sm:$0xff]  ;;  %v45_v6 = vld [vmem:[#allocation5 + $0x18] sm:$0xff]  ;;  %s316_s11 = smov [#allocation7]  }
  0x28   :  { %v206_v5 = vpack.c.bf16 %v43_v3, %v42_v2  ;;  %v209_v7 = vpack.c.bf16 %v45_v6, %v44_v4  ;;  %v46_v8 = vld [vmem:[#allocation5 + $0x20] sm:$0xff]  ;;  %v47_v9 = vld [vmem:[#allocation5 + $0x28] sm:$0xff]  ;;  %v48_v11 = vld [vmem:[#allocation5 + $0x30] sm:$0xff]  ;;  %s142_s12 = sshll.u32 %s316_s11, 4  ;;  %s143_s12 = int_to_ptr.vmem [resolvable:$true] %s142_s12 }
  0x29   :  { %v212_v10 = vpack.c.bf16 %v47_v9, %v46_v8  ;;  %v49_v12 = vld [vmem:[#allocation5 + $0x38] sm:$0xff]  ;;  %v50_v14 = vld [vmem:[#allocation5 + $0x40] sm:$0xff]  ;;  %v51_v15 = vld [vmem:[#allocation5 + $0x48] sm:$0xff]  ;;  %s281_s13 = scalar_lea.vmem %s143_s12, 128  ;;  %p286_p3 = scmp.lt.s32.totalorder %s143_s12, %s143_s12 }
  0x2a   :  { %207 = vmatpush3.bf16.msra.mxu0 %v206_v5  ;;  %v215_v13 = vpack.c.bf16 %v49_v12, %v48_v11  ;;  %v218_v16 = vpack.c.bf16 %v51_v15, %v50_v14  ;;  %v52_v17 = vld [vmem:[#allocation5 + $0x50] sm:$0xff]  ;;  %v53_v18 = vld [vmem:[#allocation5 + $0x58] sm:$0xff]  ;;  %v54_v20 = vld [vmem:[#allocation5 + $0x60] sm:$0xff]  ;;  %p282_p2 = scmp.ne.s32.totalorder %s143_s12, %s281_s13  ;;  %p287_p4 = scmp.lt.s32.totalorder %s281_s13, %s281_s13 }
  0x2b   :  { %208 = vmatprep.subr.bf16.mxu0 %v313_v0  ;;  %v221_v19 = vpack.c.bf16 %v53_v18, %v52_v17  ;;  %v55_v21 = vld [vmem:[#allocation5 + $0x68] sm:$0xff]  ;;  %v56_v23 = vld [vmem:[#allocation5 + $0x70] sm:$0xff]  ;;  %v57_v24 = vld [vmem:[#allocation5 + $0x78] sm:$0xff] }
  0x2c   :  { %v224_v22 = vpack.c.bf16 %v55_v21, %v54_v20  ;;  %v227_v25 = vpack.c.bf16 %v57_v24, %v56_v23  ;;  %v41_v26 = vld [vmem:[#allocation2] sm:$0xff]  ;;  %p288_p5 = por %p287_p4, %p286_p3 }
  0x2d   :  { %v152_v27 = vld [vmem:[%s385_s2] ss:$0 sm:$0xff] }
  0x2e   :  { %210 = vmatpush3.bf16.msra.mxu0 %v209_v7  ;;  %p289_p6 = pnand %p288_p5, %p282_p2 }
  0x2f   :  { %211 = vmatprep.subr.bf16.mxu0 %v313_v0 }
  0x32   :  { %213 = vmatpush3.bf16.msra.mxu0 %v212_v10 }
  0x33   :  { %214 = vmatprep.subr.bf16.mxu0 %v313_v0 }
  0x36   :  { %216 = vmatpush3.bf16.msra.mxu0 %v215_v13 }
  0x37   :  { %217 = vmatprep.subr.bf16.mxu0 %v313_v0 }
  0x3a   :  { %219 = vmatpush3.bf16.msra.mxu0 %v218_v16 }
  0x3b   :  { %220 = vmatprep.subr.bf16.mxu0 %v313_v0 }
  0x3e   :  { %222 = vmatpush3.bf16.msra.mxu0 %v221_v19 }
  0x3f   :  { %223 = vmatprep.subr.bf16.mxu0 %v313_v0 }
  0x42   :  { %225 = vmatpush3.bf16.msra.mxu0 %v224_v22 }
  0x43   :  { %226 = vmatprep.subr.bf16.mxu0 %v313_v0 }
  0x46   :  { %228 = vmatpush3.bf16.msra.mxu0 %v227_v25 }
  0x49   :  { %203 = vmatmul.mubr.f32.vlgmr.msra.gmra.mrb[0].mxu0 %v41_v26 }
 0x11c   :  { %v131_v28 = vpop.f32.mrb[0].mxu0 }
 0x11d   :  { %v132_v29 = vadd.f32 %v152_v27, %v131_v28  ;;  %v204_v30 = vpop.f32.mrb[1].mxu0 }
 0x11f   :  { %135 = vst [vmem:[#allocation7] sm:$0xff] %v132_v29 }
 0x120   :  { %292 = shalt.err (!%p289_p6)
}
 0x121   :  { %s293_s16 = scalar_lea.hbm %s386_s3, 128 }
 0x122   :  { %p294_p7 = scmp.ne.s32.totalorder %s386_s3, %s293_s16  ;;  %p297_p8 = scmp.lt.u32.totalorder %s293_s16, %s386_s3 }
 0x124   :  { %p299_p9 = pnand %p297_p8, %p294_p7 }
 0x126   :  { %302 = shalt.err (!%p299_p9)
}
 0x127   :  { %145 = dma.vmem_to_hbm [thread:$0]  %s143_s12, 128, %s386_s3, [#allocation4]  }
 0x128   :  { %307 = dma.done.wait [#allocation4], 128  }
 0x129   :  { %308 = vsyncadd [#allocation4], 4294967168 }
 0x12a   :  { %149 = vsyncpa [#allocation3], 1 }
 0x12b   :  { %150 = vsyncpa [#allocation6], 1 }
 0x12c   :  { %151 = vsyncpa [#allocation4], 1 }

</bundles_post_ra>
